<compile_context>
chip_gen: v5e
topology: v5e:2x2
jax: 0.10.0
libtpu: 0.0.40
codegen_flags: <defaults>
</compile_context>

<pallas_src>
import functools

import jax
import jax.numpy as jnp
from jax.experimental import pallas as pl
from jax.experimental.pallas import tpu as pltpu


def _triplet_kernel(a_ref, p_ref, n_ref, o_ref, *, margin, eps, batch):
    # a_ref/p_ref: (TB, D); n_ref: (TB, N, D); o_ref: (1, 8, 128) partial pad.
    i = pl.program_id(0)
    tb = a_ref.shape[0]

    a = a_ref[...].astype(jnp.float32)       # (TB, D)
    p = p_ref[...].astype(jnp.float32)       # (TB, D)
    negs = n_ref[...].astype(jnp.float32)    # (TB, N, D)

    # Anchor-positive distance, computed once per tile: (TB, 1).
    d_ap = jnp.sqrt(jnp.sum((a - p + eps) ** 2, axis=-1, keepdims=True))

    # Anchor-negative distances: (TB, N). Single fused expression, so no
    # explicit (TB, N, D) diff temporary is kept live in VMEM scratch.
    dan_sq = jnp.sum((a[:, None, :] - negs + eps) ** 2, axis=-1)
    d_an = jnp.sqrt(dan_sq)

    per = jnp.maximum(d_ap - d_an + margin, 0.0)           # (TB, N)

    # Mask rows that fall past the real batch (tail-tile padding); padded rows
    # would otherwise contribute relu(margin) > 0 (or garbage) to the sum.
    row = jax.lax.broadcasted_iota(jnp.int32, (tb, 1), 0) + i * tb
    per = jnp.where(row < batch, per, 0.0)

    total = jnp.sum(per)                                    # scalar partial sum
    o_ref[...] = jnp.broadcast_to(total, o_ref.shape)       # lane-dense store


def multi_negative_triplet_loss(anchor, positive, negatives, margin=0.1,
                                block_b=None):
    """anchor: (B, D), positive: (B, D), negatives: (B, N, D) -> scalar f32."""
    B, D = anchor.shape
    _, N, _ = negatives.shape

    itemsize = jnp.dtype(anchor.dtype).itemsize
    if block_b is None:
        # Size the batch tile from a conservative per-step VMEM budget so the
        # double-buffered tiles stay far below every generation's scoped VMEM
        # (v5e 16 MiB default scoped, v7x 64 MiB physical).
        budget = 8 * 1024 * 1024
        bytes_per_batch = (N * D + 2 * D) * itemsize * 2    # 2 pipeline bufs
        block_b = max(8, budget // max(bytes_per_batch, 1))
    if block_b >= B:
        block_b = B                              # one tile = full batch
    else:
        block_b = max(8, (block_b // 8) * 8)     # (8, 128) sublane rule

    grid_b = pl.cdiv(B, block_b)

    kernel = functools.partial(
        _triplet_kernel,
        margin=float(margin),   # Python scalars -> jaxpr literals,
        eps=1e-6,               # not captured array constants.
        batch=B,
    )

    partials = pl.pallas_call(
        kernel,
        out_shape=jax.ShapeDtypeStruct((grid_b, 8, 128), jnp.float32),
        grid=(grid_b,),
        in_specs=[
            pl.BlockSpec((block_b, D), lambda i: (i, 0)),
            pl.BlockSpec((block_b, D), lambda i: (i, 0)),
            pl.BlockSpec((block_b, N, D), lambda i: (i, 0, 0)),
        ],
        out_specs=pl.BlockSpec((1, 8, 128), lambda i: (i, 0, 0)),
        compiler_params=pltpu.CompilerParams(
            dimension_semantics=("parallel",),     # megacore-shardable
            vmem_limit_bytes=32 * 1024 * 1024,
        ),
    )(anchor, positive, negatives)

    # One partial per tile lives at [tile, 0, 0]; finish the tiny reduction
    # and the 1/(B*N) scale (Python float constant) in plain XLA.
    tile_sums = partials[:, 0, 0]
    return jnp.sum(tile_sums) * (1.0 / (B * N))


def _reference(anchor, positive, negatives, margin=0.1, eps=1e-6):
    d_ap = jnp.sqrt(jnp.sum((anchor - positive + eps) ** 2, axis=-1))   # (B,)
    diff = anchor[:, None, :] - negatives + eps                         # (B,N,D)
    d_an = jnp.sqrt(jnp.sum(diff * diff, axis=-1))                      # (B,N)
    per = jnp.maximum(d_ap[:, None] - d_an + margin, 0.0)
    return jnp.mean(per)


if __name__ == "__main__":
    key = jax.random.PRNGKey(0)
    k1, k2, k3 = jax.random.split(key, 3)

    # B=30 is deliberately NOT a multiple of the batch tile so the tail-mask
    # path is exercised; block_b=8 gives a 4-step pipelined grid.
    B, N, D = 30, 4, 32
    anchor = jax.random.normal(k1, (B, D), dtype=jnp.float32)
    positive = jax.random.normal(k2, (B, D), dtype=jnp.float32)
    negatives = jax.random.normal(k3, (B, N, D), dtype=jnp.float32)

    loss = multi_negative_triplet_loss(anchor, positive, negatives,
                                       margin=0.1, block_b=8)
    loss = jax.block_until_ready(loss)

    ref = _reference(anchor, positive, negatives, margin=0.1)
    assert jnp.allclose(loss, ref, atol=1e-5, rtol=1e-5), (loss, ref)

    # Also exercise the single-tile (full-batch) path once.
    loss2 = jax.block_until_ready(
        multi_negative_triplet_loss(anchor, positive, negatives, margin=0.1))
    assert jnp.allclose(loss2, ref, atol=1e-5, rtol=1e-5), (loss2, ref)

    print("KERNEL_OK")
</pallas_src>

<mosaic_0001>
module attributes {stable_mosaic.version = 11 : i64} {
  func.func @_triplet_kernel(%arg0: i32, %arg1: memref<8x32xf32, #tpu.memory_space<vmem>>, %arg2: memref<8x32xf32, #tpu.memory_space<vmem>>, %arg3: memref<8x4x32xf32, #tpu.memory_space<vmem>>, %arg4: memref<1x8x128xf32, #tpu.memory_space<vmem>>) attributes {dimension_semantics = [#tpu.dimension_semantics<parallel>], iteration_bounds = array<i64: 4>, scalar_prefetch = 0 : i64, scratch_operands = 0 : i64, tpu.core_type = #tpu.core_type<tc>, window_params = [{transform_indices = @transform_0, window_bounds = array<i64: 8, 32>}, {transform_indices = @transform_1, window_bounds = array<i64: 8, 32>}, {transform_indices = @transform_2, window_bounds = array<i64: 8, 4, 32>}, {transform_indices = @transform_3, window_bounds = array<i64: 1, 8, 128>}]} {
    %c0 = arith.constant 0 : index
    %c0_0 = arith.constant 0 : index
    %0 = vector.load %arg1[%c0, %c0_0] : memref<8x32xf32, #tpu.memory_space<vmem>>, vector<8x32xf32>
    %c0_1 = arith.constant 0 : index
    %c0_2 = arith.constant 0 : index
    %1 = vector.load %arg2[%c0_1, %c0_2] : memref<8x32xf32, #tpu.memory_space<vmem>>, vector<8x32xf32>
    %c0_3 = arith.constant 0 : index
    %c0_4 = arith.constant 0 : index
    %c0_5 = arith.constant 0 : index
    %2 = vector.load %arg3[%c0_3, %c0_4, %c0_5] : memref<8x4x32xf32, #tpu.memory_space<vmem>>, vector<8x4x32xf32>
    %3 = arith.subf %0, %1 : vector<8x32xf32>
    %cst = arith.constant 9.99999997E-7 : f32
    %4 = vector.broadcast %cst : f32 to vector<8x32xf32>
    %5 = arith.addf %3, %4 : vector<8x32xf32>
    %6 = arith.mulf %5, %5 : vector<8x32xf32>
    %cst_6 = arith.constant dense<0.000000e+00> : vector<8xf32>
    %7 = vector.multi_reduction <add>, %6, %cst_6 [1] : vector<8x32xf32> to vector<8xf32>
    %8 = vector.shape_cast %7 : vector<8xf32> to vector<8x1xf32>
    %9 = math.sqrt %8 : vector<8x1xf32>
    %10 = vector.shape_cast %0 : vector<8x32xf32> to vector<8x1x32xf32>
    %11 = vector.broadcast %10 : vector<8x1x32xf32> to vector<8x4x32xf32>
    %12 = arith.subf %11, %2 : vector<8x4x32xf32>
    %cst_7 = arith.constant 9.99999997E-7 : f32
    %13 = vector.broadcast %cst_7 : f32 to vector<8x4x32xf32>
    %14 = arith.addf %12, %13 : vector<8x4x32xf32>
    %15 = arith.mulf %14, %14 : vector<8x4x32xf32>
    %cst_8 = arith.constant dense<0.000000e+00> : vector<8x4xf32>
    %16 = vector.multi_reduction <add>, %15, %cst_8 [2] : vector<8x4x32xf32> to vector<8x4xf32>
    %17 = math.sqrt %16 : vector<8x4xf32>
    %18 = vector.broadcast %9 : vector<8x1xf32> to vector<8x4xf32>
    %19 = arith.subf %18, %17 : vector<8x4xf32>
    %cst_9 = arith.constant 1.000000e-01 : f32
    %20 = vector.broadcast %cst_9 : f32 to vector<8x4xf32>
    %21 = arith.addf %19, %20 : vector<8x4xf32>
    %cst_10 = arith.constant 0.000000e+00 : f32
    %22 = vector.broadcast %cst_10 : f32 to vector<8x4xf32>
    %23 = arith.maximumf %21, %22 : vector<8x4xf32>
    %24 = tpu.iota {dimensions = array<i32: 0>} : vector<8x1xi32>
    %c8_i32 = arith.constant 8 : i32
    %25 = arith.muli %arg0, %c8_i32 : i32
    %26 = vector.broadcast %25 : i32 to vector<8x1xi32>
    %27 = arith.addi %24, %26 : vector<8x1xi32>
    %c30_i32 = arith.constant 30 : i32
    %28 = vector.broadcast %c30_i32 : i32 to vector<8x1xi32>
    %29 = arith.cmpi slt, %27, %28 : vector<8x1xi32>
    %cst_11 = arith.constant 0.000000e+00 : f32
    %30 = vector.shape_cast %29 : vector<8x1xi1> to vector<8x1xi1>
    %31 = vector.broadcast %30 : vector<8x1xi1> to vector<8x4xi1>
    %32 = vector.broadcast %cst_11 : f32 to vector<8x4xf32>
    %33 = arith.select %31, %23, %32 : vector<8x4xi1>, vector<8x4xf32>
    %34 = vector.shape_cast %33 : vector<8x4xf32> to vector<1x8x4xf32>
    %cst_12 = arith.constant dense<0.000000e+00> : vector<1xf32>
    %35 = vector.multi_reduction <add>, %34, %cst_12 [1, 2] : vector<1x8x4xf32> to vector<1xf32>
    %36 = vector.shape_cast %35 : vector<1xf32> to vector<1x1x1xf32>
    %37 = vector.extract %36[0, 0, 0] : f32 from vector<1x1x1xf32>
    %38 = vector.broadcast %37 : f32 to vector<1x8x128xf32>
    %c0_13 = arith.constant 0 : index
    %c0_14 = arith.constant 0 : index
    %c0_15 = arith.constant 0 : index
    %39 = vector.load %arg4[%c0_13, %c0_14, %c0_15] : memref<1x8x128xf32, #tpu.memory_space<vmem>>, vector<1x8x128xf32>
    tpu.vector_store %arg4[%c0_13, %c0_14, %c0_15], %38 {strides = array<i32>} : memref<1x8x128xf32, #tpu.memory_space<vmem>>, vector<1x8x128xf32>,
    return
  }
  func.func @transform_0(%arg0: i32) -> (i32, i32) {
    %c0_i32 = arith.constant 0 : i32
    %c0_i32_0 = arith.constant 0 : i32
    return %arg0, %c0_i32 : i32, i32
  }
  func.func @transform_1(%arg0: i32) -> (i32, i32) {
    %c0_i32 = arith.constant 0 : i32
    %c0_i32_0 = arith.constant 0 : i32
    return %arg0, %c0_i32 : i32, i32
  }
  func.func @transform_2(%arg0: i32) -> (i32, i32, i32) {
    %c0_i32 = arith.constant 0 : i32
    %c0_i32_0 = arith.constant 0 : i32
    %c0_i32_1 = arith.constant 0 : i32
    return %arg0, %c0_i32, %c0_i32_0 : i32, i32, i32
  }
  func.func @transform_3(%arg0: i32) -> (i32, i32, i32) {
    %c0_i32 = arith.constant 0 : i32
    %c0_i32_0 = arith.constant 0 : i32
    %c0_i32_1 = arith.constant 0 : i32
    return %arg0, %c0_i32, %c0_i32_0 : i32, i32, i32
  }
}

</mosaic_0001>

<bundles_post_ra>
// kernel: tpu_custom_call.1
= control target key start
LH: loop header
LB: loop body
LE: loop exit
PB: predicated region body
PF: predicated region fallthrough
CT: control target
= control target key end

     0   :  { %8 = vsyncpa [#allocation3], 0  ;;  %s1286_s0 = inlined_call_operand.hbm [shape: f32[30,32], index: 0, kind: input, shape index: {}]   ;;  %s1287_s1 = inlined_call_operand.hbm [shape: f32[30,32], index: 1, kind: input, shape index: {}]   ;;  %s1288_s2 = inlined_call_operand.hbm [shape: f32[30,4,32], index: 2, kind: input, shape index: {}]   ;;  %s1289_s3 = inlined_call_operand.hbm [shape: f32[4,8,128], index: 3, kind: output, shape index: {}]  }
   0x1   :  { %10 = vsyncpa [#allocation3 + $0x1], 0 }
   0x2   :  { %11 = vsyncpa [#allocation6], 0 }
   0x3   :  { %13 = vsyncpa [#allocation6 + $0x1], 0 }
   0x4   :  { %14 = vsyncpa [#allocation4], 0 }
   0x5   :  { %16 = vsyncpa [#allocation4 + $0x1], 0  ;;  %s944_s12 = smov 0   ;;  %s946_s13 = smov 0  }
   0x6   :  { %s948_s14 = smov 0   ;;  %s950_s15 = smov 0  }
   0x7 LB: > { %1291 = sst [smem:[#allocation12_spill]] %s915_s14  ;;  %s965_s16 = sadd.s32 4294967295, %s919_s15   ;;  %s919_s15 = sphi %s950_s15, %s1302_s15   ;;  %s915_s14 = sphi %s948_s14, %s1299_s14   ;;  %s911_s13 = sphi %s946_s13, %s1301_s13   ;;  %s907_s12 = sphi %s944_s12, %s1300_s12  }
   0x8   : > { %s663_s17 = sadd.s32 4294967294, %s919_s15   ;;  %s969_s18 = sadd.s32 1, %s919_s15  }
   0x9   : > { %s29_s19 = sadd.s32 1, %s915_s14  ;;  %s26_s20 = ssub.s32 %s919_s15, %s969_s18 }
   0xa   : > { %p36_p0 = scmp.ne.s32.totalorder %s915_s14, %s911_s13  ;;  %p27_p1 = scmp.eq.s32.totalorder %s26_s20, 0 }
   0xb   : > { %p37_p2 = scmp.eq.s32.totalorder %s919_s15, 0  ;;  %p42_p3 = scmp.ne.s32.totalorder %s911_s13, %s907_s12 }
   0xc   : > { %p43_p4 = scmp.eq.s32.totalorder %s965_s16, 0  ;;  %p118_p7 = scmp.eq.s32.totalorder %s965_s16, 3 }
   0xd   : > { %s981_s21 = scalar_select %p27_p1, %s915_s14, %s29_s19  }
   0xe   : > { %p983_p5 = por %p37_p2, %p36_p0  ;;  %p987_p6 = por %p43_p4, %p42_p3 }
   0xf   : > { %1292 = sst [smem:[#allocation13_spill]] %s981_s21  ;;  %p124_p8 = scmp.eq.s32.totalorder %s663_s17, 3 }
  0x10   : > { %p992_p9 = por %p118_p7, %p36_p0  ;;  %p665_p11 = scmp.ge.s32.totalorder %s919_s15, 4 }
  0x11   : > { %p996_p10 = por %p124_p8, %p42_p3  ;;  %s1002_s26 = sand.u32 (!%p665_p11), 1, %s915_s14  }
  0x12   : > { %140 = sbr.rel (%p665_p11) target bundleno = 85 (0x55), region = 16  ;;  %s1005_s27 = sshll.u32 (!%p665_p11), %s919_s15, 3 }
  0x13   : > { %s666_s28 = sshll.u32 (!%p665_p11), %s1002_s26, 3  ;;  %s152_s4 = scalar_lea.hbm (!%p665_p11), %s1286_s0, %s1005_s27 }
  0x14   : > { %s154_s5 = sshll.u32 (!%p665_p11), %s152_s4, 4  ;;  %s148_s6 = scalar_lea.vmem (!%p665_p11), [#allocation2], %s666_s28  ;;  %s155_s5 = int_to_ptr.hbm [resolvable:$true] %s154_s5 }
  0x15   : > { %s156_s7 = sshll.u32 (!%p665_p11), %s148_s6, 4  ;;  %s145_s8 = scalar_lea.sflag (!%p665_p11), [#allocation3], %s1002_s26  ;;  %s157_s7 = int_to_ptr.vmem [resolvable:$true] %s156_s7 }
  0x16   : > { %s754_s9 = sshra.s32 (!%p665_p11), %s155_s5, 4  ;;  %s760_s19 = scalar_lea.hbm (!%p665_p11), %s1286_s0, 32  ;;  %s755_s9 = int_to_ptr.hbm [resolvable:$true] %s754_s9 }
  0x17   : > { %s756_s10 = scalar_lea.hbm %s755_s9, 8  ;;  %p761_p1 = scmp.lt.s32.totalorder %s755_s9, %s1286_s0 }
  0x18   : > { %p757_p12 = scmp.ne.s32.totalorder %s755_s9, %s756_s10  ;;  %p762_p2 = scmp.lt.s32.totalorder %s760_s19, %s756_s10 }
  0x1a   : > { %p758_p13 = pnand %p757_p12, %p983_p5  ;;  %p763_p3 = por %p762_p2, %p761_p1 }
  0x1c   : > { %p759_p0 = pneg %p758_p13 }
  0x1e   : > { %p764_p4 = pnand %p763_p3, %p759_p0 }
  0x20   : > { %767 = shalt.err (!%p764_p4)
}
  0x21   : > { %690 = dma.hbm_to_vmem [thread:$0]  (%p983_p5), %s155_s5, 128, %s157_s7, %s145_s8  }
  0x22   : > { %s163_s30 = sand.u32 1, %s919_s15   ;;  %s171_s11 = scalar_lea.hbm %s1287_s1, %s1005_s27 }
  0x23   : > { %s173_s17 = sshll.u32 %s171_s11, 4  ;;  %s167_s21 = scalar_lea.vmem [#allocation5], %s666_s28  ;;  %s174_s17 = int_to_ptr.hbm [resolvable:$true] %s173_s17 }
  0x24   : > { %s175_s14 = sshll.u32 %s167_s21, 4  ;;  %s1028_s9 = scalar_lea.sflag [#allocation6], %s163_s30  ;;  %s176_s14 = int_to_ptr.vmem [resolvable:$true] %s175_s14 }
  0x25   : > { %s782_s10 = sshra.s32 %s174_s17, 4  ;;  %s788_s8 = scalar_lea.hbm %s1287_s1, 32  ;;  %s783_s10 = int_to_ptr.hbm [resolvable:$true] %s782_s10 }
  0x26   : > { %s784_s19 = scalar_lea.hbm %s783_s10, 8  ;;  %p789_p12 = scmp.lt.s32.totalorder %s783_s10, %s1287_s1 }
  0x27   : > { %p785_p7 = scmp.ne.s32.totalorder %s783_s10, %s784_s19  ;;  %p790_p13 = scmp.lt.s32.totalorder %s788_s8, %s784_s19 }
  0x29   : > { %p786_p8 = pnand %p785_p7, %p983_p5  ;;  %p791_p0 = por %p790_p13, %p789_p12 }
  0x2b   : > { %p787_p11 = pneg %p786_p8 }
  0x2d   : > { %p792_p1 = pnand %p791_p0, %p787_p11 }
  0x2f   : > { %795 = shalt.err (!%p792_p1)
}
  0x30   : > { %691 = dma.hbm_to_vmem [thread:$0]  (%p983_p5), %s174_s17, 128, %s176_s14, %s1028_s9  }
  0x31   : > { %181 = sbr.rel (!%p983_p5) target bundleno = 85 (0x55), region = 28  ;;  %s670_s21 = sshll.u32 (%p983_p5), %s1002_s26, 5 }
  0x32   : > { %s188_s28 = ssub.s32 (%p983_p5), 30, %s1005_s27  ;;  %s186_s11 = scalar_lea.vmem (%p983_p5), [#allocation7], %s670_s21 }
  0x33   : > { %p189_p2 = scmp.lt.s32.totalorder (%p983_p5), %s188_s28, 8 }
  0x36   : > { %s1304_s28 = smov (!%p189_p2, %s188_s28), 8 }
  0x37   : > { %s672_s30 = sshll.u32 %s1304_s28, 2 }
  0x38   : > { %s192_s4 = ssub.s32 32, %s672_s30 }
  0x39   : > { %s193_s6 = sshll.u32 %s192_s4, 4 }
  0x3a   : > { %194 = vsyncadd %s1028_s9, %s193_s6  ;;  %p1049_p3 = scmp.ne.s32.totalorder %s672_s30, 0  ;;  %s687_s22 = sshll.u32 %s919_s15, 5 }
  0x3b   : > { %s197_s17 = scalar_lea.hbm %s1288_s2, %s687_s22  ;;  %s201_s10 = sshll.u32 %s186_s11, 4  ;;  %s1057_s10 = int_to_ptr.vmem [resolvable:$true] %s201_s10 }
  0x3c   : > { %s199_s19 = sshll.u32 %s197_s17, 4  ;;  %s676_s5 = sshll.u32 %s1304_s28, 6  ;;  %s1059_s19 = int_to_ptr.hbm [resolvable:$true] %s199_s19 }
  0x3d   : > { %s810_s7 = sshra.s32 %s1059_s19, 4  ;;  %s812_s8 = sshrl.u32 %s676_s5, 4  ;;  %s811_s7 = int_to_ptr.hbm [resolvable:$true] %s810_s7 }
  0x3e   : > { %s817_s20 = scalar_lea.hbm %s811_s7, %s812_s8  ;;  %s821_s30 = scalar_lea.hbm %s1288_s2, 120 }
  0x3f   : > { %p818_p5 = scmp.ne.s32.totalorder %s811_s7, %s817_s20  ;;  %p822_p8 = scmp.lt.s32.totalorder %s811_s7, %s1288_s2 }
  0x40   : > { %p823_p11 = scmp.lt.s32.totalorder %s821_s30, %s817_s20 }
  0x41   : > { %p819_p4 = pnand %p818_p5, %p1049_p3 }
  0x42   : > { %p824_p12 = por %p823_p11, %p822_p8 }
  0x43   : > { %p820_p7 = pneg %p819_p4 }
  0x45   : > { %p825_p13 = pnand %p824_p12, %p820_p7 }
  0x47   : > { %828 = shalt.err (!%p825_p13)
}
  0x48   : > { %s829_s11 = sshra.s32 %s1057_s10, 4  ;;  %s921_s26 = smov [#allocation7]   ;;  %s830_s11 = int_to_ptr.vmem [resolvable:$true] %s829_s11 }
  0x49   : > { %s836_s22 = scalar_lea.vmem %s830_s11, %s812_s8  ;;  %s840_s27 = scalar_lea.vmem %s921_s26, 64 }
  0x4a   : > { %p837_p0 = scmp.ne.s32.totalorder %s830_s11, %s836_s22  ;;  %p842_p5 = scmp.lt.s32.totalorder %s840_s27, %s836_s22 }
  0x4c   : > { %p838_p1 = pnand %p837_p0, %p1049_p3 }
  0x4e   : > { %p839_p2 = pneg %p838_p1 }
  0x50   : > { %p844_p4 = pnand %p842_p5, %p839_p2 }
  0x52   : > { %847 = shalt.err (!%p844_p4)
}
  0x53   : > { %s922_s17 = smov 64   ;;  %s923_s7 = smov 4  }
  0x54   : > { %207 = dma.hbm_to_vmem [thread:$0]  (%p1049_p3), %s1059_s19, %s676_s5, %s1057_s10, %s1028_s9, %s922_s17, %s922_s17, %s923_s7  }
  0x55 PF: > { %p677_p7 = scmp.ge.s32.totalorder %s919_s15, 1  ;;  %p209_p8 = scmp.lt.s32.totalorder %s919_s15, 5 }
  0x57   : > { %p210_p11 = pnand %p677_p7, %p209_p8 }
  0x58   : > { %s1086_s8 = sand.u32 (!%p210_p11), 1, %s911_s13  }
  0x59   : > { %213 = sbr.rel (%p210_p11) target bundleno = 458 (0x1ca), region = 32  ;;  %s1089_s20 = sshll.u32 (!%p210_p11), %s1086_s8, 3 }
  0x5a   : > { %s216_s14 = scalar_lea.sflag (!%p210_p11), [#allocation3], %s1086_s8  ;;  %s219_s28 = scalar_lea.vmem (!%p210_p11), [#allocation2], %s1089_s20 }
  0x5e   : > { %894 = dma.done.wait (%p987_p6), %s216_s14, 128  }
  0x5f   : > { %896 = vsyncadd (%p987_p6), %s216_s14, 4294967168  ;;  %s225_s9 = sand.u32 1, %s965_s16   ;;  %s229_s19 = scalar_lea.vmem [#allocation5], %s1089_s20 }
  0x60   : > { %s226_s10 = scalar_lea.sflag [#allocation6], %s225_s9 }
  0x61   : > { %898 = dma.done.wait (%p987_p6), %s226_s10, 640  }
  0x62   : > { %900 = vsyncadd (%p987_p6), %s226_s10, 4294966656  ;;  %s680_s5 = sshll.u32 %s1086_s8, 5  ;;  %v278_v0 = vld [vmem:[%s219_s28] sm:$0xff]  ;;  %vm355_vm0 = vcmask 257024   ;;  %v279_v40 = vld [vmem:[%s229_s19] sm:$0xff]  ;;  %vm291_vm1 = vcmask 261120  }
  0x63   : > { %s1104_s29 = scalar_lea.vmem [#allocation7], %s680_s5  ;;  %v315_v3 = vperm.slane %v278_v0, 0  ;;  %v311_v4 = vrot.slane %v278_v0, 4  ;;  %v309_v6 = vrot.slane %v278_v0, 2  ;;  %v308_v7 = vrot.slane %v278_v0, 1  ;;  %s682_s23 = sshll.u32 %s965_s16, 3 }
  0x64   : > { %v280_v1 = vld [vmem:[%s1104_s29] sm:$0xf]  ;;  %v284_v2 = vld [vmem:[%s1104_s29 + $0x10] sm:$0xf]  ;;  %v282_v5 = vld [vmem:[%s1104_s29 + $0x8] sm:$0xf]  ;;  %v288_v48 = vsub.f32 %v278_v0, %v279_v40  ;;  %s545_s4 = scalar_lea.hbm %s1289_s3, %s682_s23 }
  0x65   : > { %v281_v8 = vld [vmem:[%s1104_s29 + $0x4] sm:$0xf]  ;;  %v285_v9 = vld [vmem:[%s1104_s29 + $0x14] sm:$0xf]  ;;  %v312_v10 = vrot.slane %v278_v0, 5  ;;  %v310_v11 = vrot.slane %v278_v0, 3  ;;  %v331_v12 = vsub.f32 %v315_v3, %v280_v1 }
  0x66   : > { %v319_v13 = vperm.slane %v311_v4, 0  ;;  %v317_v14 = vperm.slane %v309_v6, 0  ;;  %v316_v15 = vperm.slane %v308_v7, 0  ;;  %v283_v16 = vld [vmem:[%s1104_s29 + $0xc] sm:$0xf]  ;;  %v313_v19 = vrot.slane %v278_v0, 6 }
  0x67   : > { %v320_v17 = vperm.slane %v312_v10, 0  ;;  %v318_v18 = vperm.slane %v310_v11, 0  ;;  %v314_v20 = vrot.slane %v278_v0, 7  ;;  %v339_v21 = vadd.f32 1e-06, %v331_v12  ;;  %s272_s6 = scalar_lea.vmem [#allocation8], %s1089_s20 }
  0x68   : > { %v335_v22 = vsub.f32 %v319_v13, %v284_v2  ;;  %v333_v23 = vsub.f32 %v317_v14, %v282_v5  ;;  %v332_v24 = vsub.f32 %v316_v15, %v281_v8  ;;  %v321_v27 = vperm.slane %v313_v19, 0  ;;  %v286_v33 = vld [vmem:[%s1104_s29 + $0x18] sm:$0xf]  ;;  %v287_v39 = vld [vmem:[%s1104_s29 + $0x1c] sm:$0xf]  ;;  %s547_s11 = sshll.u32 %s272_s6, 4  ;;  %s548_s11 = int_to_ptr.vmem [resolvable:$true] %s547_s11 }
  0x69   : > { %v336_v25 = vsub.f32 %v320_v17, %v285_v9  ;;  %v334_v26 = vsub.f32 %v318_v18, %v283_v16  ;;  %v347_v28 = vmul.f32 %v339_v21, %v339_v21  ;;  %v322_v34 = vperm.slane %v314_v20, 0  ;;  %s549_s22 = sshll.u32 %s545_s4, 4  ;;  %s535_s27 = scalar_lea.sflag [#allocation4], %s1086_s8  ;;  %s550_s22 = int_to_ptr.hbm [resolvable:$true] %s549_s22 }
  0x6a   : > { %v343_v29 = vadd.f32 1e-06, %v335_v22  ;;  %v341_v30 = vadd.f32 1e-06, %v333_v23  ;;  %v340_v31 = vadd.f32 1e-06, %v332_v24  ;;  %v337_v44 = vsub.f32 %v321_v27, %v286_v33 }
  0x6b   : > { %v344_v32 = vadd.f32 1e-06, %v336_v25  ;;  %v356_v35 = vsel %vm355_vm0, %v347_v28, 0.0  ;;  %v342_v38 = vadd.f32 1e-06, %v334_v26  ;;  %v338_v47 = vsub.f32 %v322_v34, %v287_v39  ;;  %s863_s17 = sshra.s32 %s550_s22, 4  ;;  %s864_s17 = int_to_ptr.hbm [resolvable:$true] %s863_s17 }
  0x6c   : > { %v351_v36 = vmul.f32 %v343_v29, %v343_v29  ;;  %v349_v37 = vmul.f32 %v341_v30, %v341_v30  ;;  %357 = vadd.xlane.f32.xlu0 %v356_v35  ;;  %v348_v43 = vmul.f32 %v340_v31, %v340_v31  ;;  %v345_v50 = vadd.f32 1e-06, %v337_v44  ;;  %s865_s7 = scalar_lea.hbm %s864_s17, 8  ;;  %s869_s28 = scalar_lea.hbm %s1289_s3, 32 }
  0x6d   : > { %v352_v45 = vmul.f32 %v344_v32, %v344_v32  ;;  %v350_v46 = vmul.f32 %v342_v38, %v342_v38  ;;  %v346_v53 = vadd.f32 1e-06, %v338_v47  ;;  %v289_v54 = vadd.f32 1e-06, %v288_v48  ;;  %p866_p6 = scmp.ne.s32.totalorder %s864_s17, %s865_s7  ;;  %p870_p13 = scmp.lt.s32.totalorder %s864_s17, %s1289_s3 }
  0x6e   : > { %v368_v41 = vsel %vm355_vm0, %v351_v36, 0.0  ;;  %v362_v42 = vsel %vm355_vm0, %v349_v37, 0.0  ;;  %v359_v49 = vsel %vm355_vm0, %v348_v43, 0.0  ;;  %v353_v55 = vmul.f32 %v345_v50, %v345_v50  ;;  %p871_p0 = scmp.lt.s32.totalorder %s869_s28, %s865_s7 }
  0x6f   : > { %369 = vadd.xlane.f32.xlu2 %v368_v41  ;;  %363 = vadd.xlane.f32.xlu1 %v362_v42  ;;  %v371_v51 = vsel %vm355_vm0, %v352_v45, 0.0  ;;  %v365_v52 = vsel %vm355_vm0, %v350_v46, 0.0  ;;  %v354_v56 = vmul.f32 %v346_v53, %v346_v53  ;;  %v290_v57 = vmul.f32 %v289_v54, %v289_v54  ;;  %p867_p3 = pnand %p866_p6, %p992_p9 }
  0x70   : > { %v374_v58 = vsel %vm355_vm0, %v353_v55, 0.0  ;;  %v484_v10 = vlaneseq  ;;  %vm494_vm11 = vcmask 1041409   ;;  %vm496_vm13 = vcmask 1042434   ;;  %p872_p1 = por %p871_p0, %p870_p13 }
  0x71   : > { %v377_v59 = vsel %vm355_vm0, %v354_v56, 0.0  ;;  %v292_v60 = vsel %vm291_vm1, %v290_v57, 0.0  ;;  %vm498_vm15 = vcmask 1043459   ;;  %vm500_vm1 = vcmask 1044484   ;;  %p868_p12 = pneg %p867_p3 }
  0x72   : > { %v1148_v19 = vand.u32 127, %v484_v10 }
  0x73   : > { %p873_p2 = pnand %p872_p1, %p868_p12 }
  0x74   : > { %360 = vadd.xlane.f32.xlu0 %v359_v49 }
  0x77   : > { %372 = vadd.xlane.f32.xlu2 %v371_v51  ;;  %366 = vadd.xlane.f32.xlu1 %v365_v52 }
  0x7c   : > { %375 = vadd.xlane.f32.xlu0 %v374_v58 }
  0x7f   : > { %378 = vadd.xlane.f32.xlu1 %v377_v59  ;;  %293 = vadd.xlane.f32.xlu2 %v292_v60 }
  0xdf   : > { %v1124_v61 = vpop.xlane.xlu0 %357 }
  0xe0   : > { %736 = vrsqrt.f32 %v1124_v61  ;;  %vm387_vm2 = vcmp.eq.f32.partialorder %v1124_v61, inf  ;;  %v390_v17 = vand.u32 2147483648, %v1124_v61  ;;  %vm389_vm5 = vcmp.eq.f32.partialorder %v1124_v61, 0.0 }
  0xe2   : > { %v1127_v62 = vpop.xlane.xlu2 %369  ;;  %v1129_v63 = vpop.xlane.xlu1 %363 }
  0xe3   : > { %738 = vrsqrt.f32 %v1127_v62  ;;  %vm435_vm3 = vcmp.eq.f32.partialorder %v1127_v62, inf  ;;  %v438_v25 = vand.u32 2147483648, %v1127_v62  ;;  %vm411_vm4 = vcmp.eq.f32.partialorder %v1129_v63, inf }
  0xe4   : > { %740 = vrsqrt.f32 %v1129_v63  ;;  %vm413_vm6 = vcmp.eq.f32.partialorder %v1129_v63, 0.0  ;;  %v414_v29 = vand.u32 2147483648, %v1129_v63  ;;  %vm437_vm7 = vcmp.eq.f32.partialorder %v1127_v62, 0.0 }
  0xe6   : > { %v737_v0 = vpop.eup %736 }
  0xe7   : > { %v381_v1 = vmul.f32 %v737_v0, %v1124_v61  ;;  %v1134_v2 = vpop.xlane.xlu0 %360 }
  0xe8   : > { %742 = vrsqrt.f32 %v1134_v2  ;;  %vm399_vm8 = vcmp.eq.f32.partialorder %v1134_v2, inf  ;;  %vm401_vm9 = vcmp.eq.f32.partialorder %v1134_v2, 0.0  ;;  %v402_v41 = vand.u32 2147483648, %v1134_v2 }
  0xe9   : > { %v739_v3 = vpop.eup %738  ;;  %v382_v5 = vmul.f32 %v737_v0, %v381_v1 }
  0xea   : > { %v741_v4 = vpop.eup %740  ;;  %v429_v6 = vmul.f32 %v739_v3, %v1127_v62  ;;  %v1138_v7 = vpop.xlane.xlu2 %372 }
  0xeb   : > { %v1140_v8 = vpop.xlane.xlu1 %366  ;;  %v405_v9 = vmul.f32 %v741_v4, %v1129_v63  ;;  %744 = vrsqrt.f32 %v1138_v7  ;;  %v383_v11 = vmul.f32 0.5, %v382_v5  ;;  %vm447_vm10 = vcmp.eq.f32.partialorder %v1138_v7, inf }
  0xec   : > { %v430_v12 = vmul.f32 %v739_v3, %v429_v6  ;;  %746 = vrsqrt.f32 %v1140_v8  ;;  %v450_v45 = vand.u32 2147483648, %v1138_v7  ;;  %vm423_vm12 = vcmp.eq.f32.partialorder %v1140_v8, inf }
  0xed   : > { %v406_v13 = vmul.f32 %v741_v4, %v405_v9  ;;  %v384_v14 = vsub.f32 1.5, %v383_v11  ;;  %vm449_vm14 = vcmp.eq.f32.partialorder %v1138_v7, 0.0  ;;  %vm425_vm0 = vcmp.eq.f32.partialorder %v1140_v8, 0.0 }
  0xee   : > { %v431_v15 = vmul.f32 0.5, %v430_v12  ;;  %v743_v16 = vpop.eup %742  ;;  %v426_v56 = vand.u32 2147483648, %v1140_v8 }
  0xef   : > { %v407_v18 = vmul.f32 0.5, %v406_v13  ;;  %v385_v20 = vmul.f32 %v737_v0, %v384_v14  ;;  %v393_v22 = vmul.f32 %v743_v16, %v1134_v2  ;;  %v1152_v23 = vpop.xlane.xlu0 %375 }
  0xf0   : > { %v432_v21 = vsub.f32 1.5, %v431_v15  ;;  %748 = vrsqrt.f32 %v1152_v23 }
  0xf1   : > { %v745_v24 = vpop.eup %744  ;;  %v408_v26 = vsub.f32 1.5, %v407_v18  ;;  %v394_v30 = vmul.f32 %v743_v16, %v393_v22  ;;  %v386_v33 = vmul.f32 %v385_v20, %v1124_v61 }
  0xf2   : > { %v747_v27 = vpop.eup %746  ;;  %v433_v28 = vmul.f32 %v739_v3, %v432_v21  ;;  %v441_v31 = vmul.f32 %v745_v24, %v1138_v7  ;;  %v1169_v38 = vpop.xlane.xlu2 %293 }
  0xf3   : > { %v1161_v32 = vpop.xlane.xlu1 %378  ;;  %v409_v34 = vmul.f32 %v741_v4, %v408_v26  ;;  %v417_v35 = vmul.f32 %v747_v27, %v1140_v8  ;;  %v395_v36 = vmul.f32 0.5, %v394_v30  ;;  %v388_v47 = vsel %vm387_vm2, %v1124_v61, %v386_v33 }
  0xf4   : > { %750 = vrsqrt.f32 %v1161_v32  ;;  %v442_v37 = vmul.f32 %v745_v24, %v441_v31  ;;  %v434_v39 = vmul.f32 %v433_v28, %v1127_v62  ;;  %v391_v0 = vsel %vm389_vm5, %v390_v17, %v388_v47 }
  0xf5   : > { %v410_v40 = vmul.f32 %v409_v34, %v1129_v63  ;;  %v418_v42 = vmul.f32 %v747_v27, %v417_v35  ;;  %v396_v43 = vsub.f32 1.5, %v395_v36  ;;  %752 = vrsqrt.f32 %v1169_v38 }
  0xf6   : > { %v443_v44 = vmul.f32 0.5, %v442_v37  ;;  %v749_v46 = vpop.eup %748  ;;  %v436_v54 = vsel %vm435_vm3, %v1127_v62, %v434_v39  ;;  %vm502_vm2 = vcmask 1045509   ;;  %vm504_vm3 = vcmask 1046534  }
  0xf7   : > { %v419_v48 = vmul.f32 0.5, %v418_v42  ;;  %v412_v49 = vsel %vm411_vm4, %v1129_v63, %v410_v40  ;;  %v397_v50 = vmul.f32 %v743_v16, %v396_v43  ;;  %v453_v52 = vmul.f32 %v749_v46, %v1152_v23 }
  0xf8   : > { %v444_v51 = vsub.f32 1.5, %v443_v44  ;;  %v415_v1 = vsel %vm413_vm6, %v414_v29, %v412_v49  ;;  %v439_v63 = vsel %vm437_vm7, %v438_v25, %v436_v54  ;;  %v486_v17 = vperm.slane %v391_v0, %v1148_v19 }
  0xf9   : > { %v420_v55 = vsub.f32 1.5, %v419_v48  ;;  %v398_v57 = vmul.f32 %v397_v50, %v1134_v2  ;;  %v454_v59 = vmul.f32 %v749_v46, %v453_v52  ;;  %v488_v62 = vperm.slane %v415_v1, %v1148_v19 }
  0xfa   : > { %v751_v53 = vpop.eup %750  ;;  %v445_v58 = vmul.f32 %v745_v24, %v444_v51  ;;  %vm459_vm4 = vcmp.eq.f32.partialorder %v1152_v23, inf  ;;  %v462_v33 = vand.u32 2147483648, %v1152_v23  ;;  %vm461_vm5 = vcmp.eq.f32.partialorder %v1152_v23, 0.0 }
  0xfb   : > { %v465_v60 = vmul.f32 %v751_v53, %v1161_v32  ;;  %v421_v3 = vmul.f32 %v747_v27, %v420_v55  ;;  %v400_v4 = vsel %vm399_vm8, %v1134_v2, %v398_v57  ;;  %v455_v6 = vmul.f32 0.5, %v454_v59  ;;  %v753_v11 = vpop.eup %752 }
  0xfc   : > { %v446_v5 = vmul.f32 %v445_v58, %v1138_v7  ;;  %v403_v12 = vsel %vm401_vm9, %v402_v41, %v400_v4  ;;  %v296_v16 = vmul.f32 %v753_v11, %v1169_v38  ;;  %v490_v27 = vperm.slane %v439_v63, %v1148_v19 }
  0xfd   : > { %v466_v9 = vmul.f32 %v751_v53, %v465_v60  ;;  %v422_v61 = vmul.f32 %v421_v3, %v1140_v8  ;;  %v456_v14 = vsub.f32 1.5, %v455_v6  ;;  %v487_v18 = vperm.slane %v403_v12, %v1148_v19 }
  0xfe   : > { %v448_v13 = vsel %vm447_vm10, %v1138_v7, %v446_v5  ;;  %v297_v24 = vmul.f32 %v753_v11, %v296_v16  ;;  %vm471_vm6 = vcmp.eq.f32.partialorder %v1161_v32, inf  ;;  %v474_v39 = vand.u32 2147483648, %v1161_v32 }
  0xff   : > { %v467_v15 = vmul.f32 0.5, %v466_v9  ;;  %v424_v2 = vsel %vm423_vm12, %v1140_v8, %v422_v61  ;;  %v457_v21 = vmul.f32 %v749_v46, %v456_v14  ;;  %v451_v25 = vsel %vm449_vm14, %v450_v45, %v448_v13 }
 0x100   : > { %v427_v20 = vsel %vm425_vm0, %v426_v56, %v424_v2  ;;  %v495_v28 = vsel %vm494_vm11, %v487_v18, %v486_v17  ;;  %v298_v31 = vmul.f32 0.5, %v297_v24  ;;  %v491_v41 = vperm.slane %v451_v25, %v1148_v19 }
 0x101   : > { %v468_v22 = vsub.f32 1.5, %v467_v15  ;;  %v489_v26 = vperm.slane %v427_v20, %v1148_v19  ;;  %v458_v29 = vmul.f32 %v457_v21, %v1152_v23  ;;  %v497_v8 = vsel %vm496_vm13, %v488_v62, %v495_v28 }
 0x102   : > { %v299_v35 = vsub.f32 1.5, %v298_v31  ;;  %vm473_vm7 = vcmp.eq.f32.partialorder %v1161_v32, 0.0  ;;  %vm506_vm8 = vcmask 1047559   ;;  %v513_v46 = vshrl.u32 %v484_v10, 7 }
 0x103   : > { %v469_v30 = vmul.f32 %v751_v53, %v468_v22  ;;  %v499_v7 = vsel %vm498_vm15, %v489_v26, %v497_v8  ;;  %v460_v36 = vsel %vm459_vm4, %v1152_v23, %v458_v29  ;;  %v515_v50 = vstv %s682_s23 }
 0x104   : > { %v501_v37 = vsel %vm500_vm1, %v490_v27, %v499_v7  ;;  %v463_v40 = vsel %vm461_vm5, %v462_v33, %v460_v36  ;;  %v300_v43 = vmul.f32 %v753_v11, %v299_v35  ;;  %vm302_vm9 = vcmp.eq.f32.partialorder %v1169_v38, inf }
 0x105   : > { %v470_v34 = vmul.f32 %v469_v30, %v1161_v32  ;;  %v492_v44 = vperm.slane %v463_v40, %v1148_v19  ;;  %v503_v23 = vsel %vm502_vm2, %v491_v41, %v501_v37  ;;  %vm304_vm10 = vcmp.eq.f32.partialorder %v1169_v38, 0.0 }
 0x106   : > { %v301_v47 = vmul.f32 %v300_v43, %v1169_v38  ;;  %v516_v54 = vadd.s32 %v515_v50, %v513_v46  ;;  %vm521_vm12 = vcmask 31744  }
 0x107   : > { %v472_v42 = vsel %vm471_vm6, %v1161_v32, %v470_v34  ;;  %v505_v49 = vsel %vm504_vm3, %v492_v44, %v503_v23  ;;  %v305_v32 = vand.u32 2147483648, %v1169_v38 }
 0x108   : > { %v475_v45 = vsel %vm473_vm7, %v474_v39, %v472_v42  ;;  %v303_v51 = vsel %vm302_vm9, %v1169_v38, %v301_v47  ;;  %vm517_vm11 = vcmp.lt.s32.totalorder %v516_v54, 30 }
 0x109   : > { %v493_v48 = vperm.slane %v475_v45, %v1148_v19  ;;  %v306_v53 = vsel %vm304_vm10, %v305_v32, %v303_v51 }
 0x10b   : > { %v507_v52 = vsel %vm506_vm8, %v493_v48, %v505_v49 }
 0x10c   : > { %v509_v10 = vsub.f32 %v306_v53, %v507_v52 }
 0x10e   : > { %v510_v55 = vadd.f32 0.1, %v509_v10 }
 0x110   : > { %v511_v19 = vmax.f32 %v510_v55, 0.0 }
 0x112   : > { %v520_v56 = vsel %vm517_vm11, %v511_v19, 0.0 }
 0x113   : > { %v522_v57 = vsel %vm521_vm12, %v520_v56, 0.0 }
 0x114   : > { %523 = vadd.xlane.f32.xlu0 %v522_v57 }
 0x187   : > { %v524_v58 = vpop.xlane.xlu0 %523 }
 0x188   : > { %v525_v59 = vrot.slane %v524_v58, 4 }
 0x18a   : > { %v526_v60 = vadd.f32 %v525_v59, %v524_v58 }
 0x18c   : > { %v527_v0 = vrot.slane %v526_v60, 2 }
 0x18e   : > { %v528_v1 = vadd.f32 %v527_v0, %v526_v60 }
 0x190   : > { %v529_v38 = vrot.slane %v528_v1, 1 }
 0x192   : > { %v530_v3 = vadd.f32 %v529_v38, %v528_v1 }
 0x194   : > { %688 = vpush %v530_v3 }
 0x1c5   : > { %s689_s26 = spop %688 }
 0x1c6   : > { %v532_v4 = vstv %s689_s26 }
 0x1c7   : > { %533 = vst [vmem:[%s272_s6] sm:$0xff] %v532_v4 }
 0x1c8   : > { %876 = shalt.err (!%p873_p2)
}
 0x1c9   : > { %695 = dma.vmem_to_hbm [thread:$0]  (%p992_p9), %s548_s11, 128, %s550_s22, %s535_s27  }
 0x1ca PF: > { %p701_p5 = scmp.ge.s32.totalorder %s919_s15, 2  ;;  %s561_s8 = sand.u32 1, %s907_s12  }
 0x1cb   : > { %s562_s10 = scalar_lea.sflag [#allocation4], %s561_s8 }
 0x1cc   : > { %p698_p4 = pnand %p701_p5, %p996_p10 }
 0x1ce   : > { %p699_p7 = pneg %p698_p4 }
 0x1d0   : > { %902 = dma.done.wait (%p699_p7), %s562_s10, 128  }
 0x1d1   : > { %904 = vsyncadd (%p699_p7), %s562_s10, 4294967168  ;;  %s1298_s19 = sld [smem:[#allocation12_spill]]  ;;  %p19_p8 = scmp.ge.s32.totalorder %s969_s18, 6  }
 0x1d2   : > { %s1299_s14 = sld [smem:[#allocation13_spill]]  ;;  %s1300_s12 = smov %s911_s13 }
 0x1d3   : > { %s1302_s15 = smov %s969_s18  ;;  %21 = sbr.rel (!%p19_p8) target bundleno = 7 (0x7), region = 101 }
 0x1d7   : > { %s1301_s13 = smov %s1298_s19 }
 0x1d8   :  { %568 = vsyncpa [#allocation3], 1 }
 0x1d9   :  { %570 = vsyncpa [#allocation3 + $0x1], 1 }
 0x1da   :  { %571 = vsyncpa [#allocation6], 1 }
 0x1db   :  { %573 = vsyncpa [#allocation6 + $0x1], 1 }
 0x1dc   :  { %574 = vsyncpa [#allocation4], 1 }
 0x1dd   :  { %576 = vsyncpa [#allocation4 + $0x1], 1 }

</bundles_post_ra>
